<compile_context>
chip_gen: v5e
topology: v5e:2x2
jax: 0.10.0
libtpu: 0.0.40
codegen_flags: <defaults>
</compile_context>

<pallas_src>
import jax
import jax.numpy as jnp
from jax.experimental import pallas as pl
from jax.experimental.pallas import tpu as pltpu

_LANE = 128
_MAX_BLOCK_BYTES = 16 * 1024 * 1024      # cap per-block bytes even with big VMEM (v5e/v6e)
_FALLBACK_PHYS_VMEM = 64 * 1024 * 1024   # v7x has the smallest physical VMEM


def _identity_copy_kernel(x_ref, o_ref):
    # Pure lane-dense 2-D copy: whole-block load + store, no relayout.
    o_ref[...] = x_ref[...]


def _hbm_copy_kernel(x_hbm_ref, o_hbm_ref, sem):
    # Single HBM->HBM DMA of the whole (already-flat) array: no grid, no VMEM
    # round trip. TODO(synk): with a donatable input, input_output_aliases={0: 0}
    # would make this a pure metadata op (no copy at all).
    cp = pltpu.make_async_copy(x_hbm_ref, o_hbm_ref, sem)
    cp.start()
    cp.wait()


def _round_down(x: int, m: int) -> int:
    return (x // m) * m


def _round_up(x: int, m: int) -> int:
    return ((x + m - 1) // m) * m


def _sublane_unit(dtype) -> int:
    """Dtype-aware sublane unit for the second-minor axis (sub-32-bit dtypes
    pack along sublanes)."""
    bits = jnp.dtype(dtype).itemsize * 8
    if bits >= 32:
        return 8
    if bits == 16:
        return 16
    return 32  # int8 / fp8


def _vmem_limit_bytes() -> int:
    """Scoped-VMEM limit to request: ~3/4 of physical, capped at 96 MiB.
    (64 MiB v7x -> 48 MiB; 128 MiB v5e/v6e -> 96 MiB.)"""
    try:
        phys = int(pltpu.get_tpu_info().vmem_capacity_bytes)
    except Exception:
        phys = _FALLBACK_PHYS_VMEM
    return min(phys * 3 // 4, 96 * 1024 * 1024)


def _pick_blocks(b: int, flat: int, itemsize: int, sub: int, block_budget: int):
    """Choose (block_b, block_f) under a per-block byte budget, preferring
    contiguous full-row blocks; misaligned dims keep aligned blocks and rely
    on Pallas tail masking (full extent only when the dim < its unit)."""
    row_bytes = max(flat * itemsize, 1)
    rows_max = block_budget // row_bytes

    if flat <= _LANE or rows_max >= sub or rows_max >= max(b, 1):
        # Full rows fit: tile only the batch axis -> one contiguous DMA
        # descriptor per block.
        block_f = flat
        if b <= rows_max:
            if b >= 2 * sub:
                # Whole array fits a single block; split the batch axis so
                # both v7x TensorCores get a block (negligible on v5e/v6e).
                block_b = _round_up(pl.cdiv(b, 2), sub)
            else:
                block_b = b                       # small batch: full extent
        elif b <= sub:
            block_b = b                           # full (small) batch
        else:
            block_b = max(_round_down(min(rows_max, b), sub), sub)
    else:
        # Even `sub` full rows exceed the budget: tile the flat (lane) axis
        # too with 128-multiple blocks; tails are masked by Pallas.
        block_b = b if b < sub else sub
        lane_budget = block_budget // max(block_b * itemsize, 1)
        block_f = max(_round_down(min(lane_budget, flat), _LANE), _LANE)
    return block_b, block_f


def _flatten_tiled(x2: jax.Array) -> jax.Array:
    b, flat = x2.shape
    itemsize = jnp.dtype(x2.dtype).itemsize
    sub = _sublane_unit(x2.dtype)

    vmem_limit = _vmem_limit_bytes()
    # in + out, each double-buffered -> 4 live block buffers; keep ~12% slack.
    block_budget = min((vmem_limit * 7 // 8) // 4, _MAX_BLOCK_BYTES)

    block_b, block_f = _pick_blocks(b, flat, itemsize, sub, block_budget)
    grid = (pl.cdiv(b, block_b), pl.cdiv(flat, block_f))
    spec = pl.BlockSpec((block_b, block_f), lambda i, j: (i, j))

    return pl.pallas_call(
        _identity_copy_kernel,
        out_shape=jax.ShapeDtypeStruct((b, flat), x2.dtype),
        grid=grid,
        in_specs=[spec],
        out_specs=spec,
        compiler_params=pltpu.CompilerParams(
            dimension_semantics=("parallel", "parallel"),
            vmem_limit_bytes=int(vmem_limit),
        ),
        cost_estimate=pl.CostEstimate(
            flops=0, transcendentals=0,
            bytes_accessed=2 * b * flat * itemsize),
    )(x2)


def _flatten_single_dma(x2: jax.Array) -> jax.Array:
    b, flat = x2.shape
    itemsize = jnp.dtype(x2.dtype).itemsize
    return pl.pallas_call(
        _hbm_copy_kernel,
        out_shape=jax.ShapeDtypeStruct((b, flat), x2.dtype),
        in_specs=[pl.BlockSpec(memory_space=pl.ANY)],
        out_specs=pl.BlockSpec(memory_space=pl.ANY),
        scratch_shapes=[pltpu.SemaphoreType.DMA],
        cost_estimate=pl.CostEstimate(
            flops=0, transcendentals=0,
            bytes_accessed=2 * b * flat * itemsize),
    )(x2)


def flatten(x: jax.Array, *, single_dma: bool = False) -> jax.Array:
    """Pallas equivalent of Flatten.forward: (B, ...) -> (B, prod(...)).

    single_dma=False: tiled lane-dense grid copy through VMEM (fusion anchor).
    single_dma=True : one HBM->HBM DMA, no grid overhead (standalone use).
    """
    b = x.shape[0]
    flat = 1
    for d in x.shape[1:]:
        flat *= d

    # Metadata-only reshape in the wrapper for contiguous row-major inputs
    # (matches torch .view); the kernels never relayout vregs. If x arrives
    # transposed/strided, XLA materializes the copy outside the kernel.
    x2 = jnp.reshape(x, (b, flat))

    if single_dma:
        return _flatten_single_dma(x2)
    return _flatten_tiled(x2)


if __name__ == "__main__":
    key = jax.random.PRNGKey(0)
    key0, key1 = jax.random.split(key)

    # Small NCL input consistent with a 1-D VAE: batch=2, channels=4, length=32.
    x = jax.random.normal(key0, (2, 4, 32), dtype=jnp.float32)
    y_ref = x.reshape(x.shape[0], -1)

    # Tiled grid-copy path (fusion anchor).
    y_tiled = flatten(x)
    jax.block_until_ready(y_tiled)
    assert y_tiled.shape == (2, 4 * 32), y_tiled.shape
    assert y_tiled.dtype == x.dtype
    assert jnp.array_equal(y_tiled, y_ref), "tiled flatten mismatch vs reference"

    # Single HBM->HBM DMA path (standalone fast path).
    y_dma = flatten(x, single_dma=True)
    jax.block_until_ready(y_dma)
    assert jnp.array_equal(y_dma, y_ref), "single-DMA flatten mismatch vs reference"

    # Misaligned dims (batch and flat not multiples of 8/128) use legal
    # full-extent blocks at small sizes.
    x_odd = jax.random.normal(key1, (3, 5, 7), dtype=jnp.float32)
    y_odd = flatten(x_odd)
    jax.block_until_ready(y_odd)
    assert jnp.array_equal(y_odd, x_odd.reshape(3, -1)), "misaligned flatten mismatch"

    print("KERNEL_OK")
</pallas_src>

<mosaic_0001>
module attributes {stable_mosaic.version = 11 : i64} {
  func.func @_identity_copy_kernel(%arg0: i32, %arg1: i32, %arg2: memref<2x128xf32, #tpu.memory_space<vmem>>, %arg3: memref<2x128xf32, #tpu.memory_space<vmem>>) attributes {dimension_semantics = [#tpu.dimension_semantics<parallel>, #tpu.dimension_semantics<parallel>], iteration_bounds = array<i64: 1, 1>, scalar_prefetch = 0 : i64, scratch_operands = 0 : i64, tpu.core_type = #tpu.core_type<tc>, window_params = [{transform_indices = @transform_0, window_bounds = array<i64: 2, 128>}, {transform_indices = @transform_1, window_bounds = array<i64: 2, 128>}]} {
    %c0 = arith.constant 0 : index
    %c0_0 = arith.constant 0 : index
    %0 = vector.load %arg2[%c0, %c0_0] : memref<2x128xf32, #tpu.memory_space<vmem>>, vector<2x128xf32>
    %c0_1 = arith.constant 0 : index
    %c0_2 = arith.constant 0 : index
    %1 = vector.load %arg3[%c0_1, %c0_2] : memref<2x128xf32, #tpu.memory_space<vmem>>, vector<2x128xf32>
    tpu.vector_store %arg3[%c0_1, %c0_2], %0 {strides = array<i32>} : memref<2x128xf32, #tpu.memory_space<vmem>>, vector<2x128xf32>,
    return
  }
  func.func @transform_0(%arg0: i32, %arg1: i32) -> (i32, i32) {
    %c0_i32 = arith.constant 0 : i32
    return %arg0, %arg1 : i32, i32
  }
  func.func @transform_1(%arg0: i32, %arg1: i32) -> (i32, i32) {
    %c0_i32 = arith.constant 0 : i32
    return %arg0, %arg1 : i32, i32
  }
}

</mosaic_0001>

<bundles_post_ra>
// kernel: tpu_custom_call.1
= control target key start
LH: loop header
LB: loop body
LE: loop exit
PB: predicated region body
PF: predicated region fallthrough
CT: control target
= control target key end

     0   :  { %6 = vsyncpa [#allocation3], 0  ;;  %s114_s0 = inlined_call_operand.hbm [shape: f32[2,128], index: 0, kind: input, shape index: {}]   ;;  %s115_s1 = inlined_call_operand.hbm [shape: f32[2,128], index: 1, kind: output, shape index: {}]  }
   0x1   :  { %7 = vsyncpa [#allocation4], 0  ;;  %s13_s8 = sshll.u32 %s114_s0, 4  ;;  %s96_s9 = smov [#allocation2]   ;;  %s14_s8 = int_to_ptr.hbm [resolvable:$true] %s13_s8 }
   0x2   :  { %s15_s10 = sshll.u32 %s96_s9, 4  ;;  %s16_s10 = int_to_ptr.vmem [resolvable:$true] %s15_s10 }
   0x3   :  { %18 = dma.hbm_to_vmem [thread:$0]  %s14_s8, 32, %s16_s10, [#allocation3]  }
   0x4   :  { %92 = dma.done.wait [#allocation3], 32  }
   0x5   :  { %93 = vsyncadd [#allocation3], 4294967264  ;;  %s97_s11 = smov [#allocation5]   ;;  %s32_s15 = sshll.u32 %s115_s1, 4  ;;  %v23_v0 = vld [vmem:[#allocation2] sm:$0x3]  ;;  %s33_s15 = int_to_ptr.hbm [resolvable:$true] %s32_s15 }
   0x6   :  { %s30_s12 = sshll.u32 %s97_s11, 4  ;;  %24 = vst [vmem:[#allocation5] sm:$0x3] %v23_v0  ;;  %s31_s12 = int_to_ptr.vmem [resolvable:$true] %s30_s12 }
   0x7   :  { %35 = dma.vmem_to_hbm [thread:$0]  %s31_s12, 32, %s33_s15, [#allocation4]  }
   0x8   :  { %94 = dma.done.wait [#allocation4], 32  }
   0x9   :  { %95 = vsyncadd [#allocation4], 4294967264 }
   0xa   :  { %40 = vsyncpa [#allocation3], 1 }
   0xb   :  { %41 = vsyncpa [#allocation4], 1 }

</bundles_post_ra>
